<compile_context>
chip_gen: v7x
topology: tpu7x:2x2x1
jax: 0.10.0
libtpu: 0.0.40
codegen_flags: <defaults>
</compile_context>

<pallas_src>
import functools

import jax
import jax.numpy as jnp
from jax.experimental import pallas as pl
from jax.experimental.pallas import tpu as pltpu


# --------------------------------------------------------------------------- #
# helpers
# --------------------------------------------------------------------------- #
def _round_up(n, m):
    return ((n + m - 1) // m) * m


def _divisor_tile(total, pref):
    """Largest multiple of 128 dividing `total` (itself a multiple of 128), <= pref."""
    best, t = 128, 128
    while t <= min(total, pref):
        if total % t == 0:
            best = t
        t += 128
    return best


def _vmem_capacity_bytes(default=64 << 20):
    """Generation-aware VMEM capacity (v5e/v6e: 128 MiB, v7x: 64 MiB per TC)."""
    try:
        cap = int(pltpu.get_tpu_info().vmem_capacity_bytes)
        if cap > 0:
            return cap
    except Exception:
        pass
    return default


def _resident_spec(shape):
    """BlockSpec for a VMEM-resident operand: constant index_map + single buffer."""
    idx = lambda i: (0,) * len(shape)
    try:
        return pl.BlockSpec(shape, idx, pipeline_mode=pl.Buffered(1))
    except (TypeError, AttributeError):
        # Older API without pipeline_mode: fall back to default (double) buffering.
        return pl.BlockSpec(shape, idx)


def _select_tile_m(batch, sizes_pad, weight_bytes, vmem_budget, x_item, out_item):
    """Pick the batch tile from the VMEM budget remaining after resident weights."""
    in_pad, out_pad, max_feat = sizes_pad[0], sizes_pad[-1], max(sizes_pad)

    def fits(tm):
        io = 2 * tm * in_pad * x_item + 2 * tm * out_pad * out_item  # dbl-buffered x/out
        act = 2 * tm * max_feat * 4                                  # widest f32 intermediate
        return weight_bytes + io + act + (4 << 20) <= vmem_budget

    if batch <= 256:
        # Small batch: a single tile covering the (padded) batch; >=16 rows so the
        # packed bf16 (16,128) sublane layout is full.
        tile = max(16, _round_up(batch, 16))
        while tile > 16 and not fits(tile):
            tile = max(16, _round_up(tile // 2, 16))
    else:
        # Large batch: biggest MXU-friendly multiple of 256 that fits (<=1024);
        # bigger tiles amortize the ~0.35us per-grid-step overhead on v5e/v6e.
        tile = 256
        for cand in (512, 768, 1024):
            if cand <= batch and fits(cand):
                tile = cand
        while tile > 256 and pl.cdiv(batch, tile) < 2:
            tile -= 256

    # v7x megacore: prefer >=2 grid programs when the tile can be split without
    # dropping below 16 rows (weights are cheap to replicate once single-buffered).
    if tile >= 128 and _round_up(batch, tile) // tile == 1:
        half = max(16, _round_up(tile // 2, 16))
        if fits(half):
            tile = half
    return tile


# --------------------------------------------------------------------------- #
# fused kernel (all weights VMEM-resident)
# --------------------------------------------------------------------------- #
def _fcnet_kernel(x_ref, *refs, num_layers):
    """Fused MLP forward for one batch tile.

    refs = (w0, b0, ..., w{L-1}, b{L-1}, out_ref)
      w_i : (in_pad, out_pad) bf16  (pre-transposed, VMEM-resident)
      b_i : (1, out_pad)      f32   (broadcasts over the batch tile)
    """
    o_ref = refs[-1]
    wb = refs[:-1]
    h = x_ref[...].astype(jnp.bfloat16)                    # bf16 LHS for the MXU
    for i in range(num_layers):
        w = wb[2 * i][...]
        b = wb[2 * i + 1][...]
        y = jnp.dot(h, w, preferred_element_type=jnp.float32) + b
        if i < num_layers - 1:
            h = jnp.maximum(y, 0.0).astype(jnp.bfloat16)   # hidden_act = F.relu
        else:
            h = y                                          # out_act = None
    o_ref[...] = h.astype(o_ref.dtype)


def _fcnet_forward_fused(x_arr, params, tile_m, out_dtype, usable_vmem):
    w_ops, b_ops = params["weights"], params["biases"]
    sizes_pad = params["sizes_pad"]
    num_layers = len(w_ops)
    batch_pad, in_pad = x_arr.shape
    out_pad = sizes_pad[-1]
    out_item = jnp.dtype(out_dtype).itemsize
    x_item = x_arr.dtype.itemsize
    grid = (batch_pad // tile_m,)

    in_specs = [pl.BlockSpec((tile_m, in_pad), lambda i: (i, 0))]
    operands = [x_arr]
    for w_t, b_p in zip(w_ops, b_ops):
        in_specs.append(_resident_spec(w_t.shape))   # weight: resident, single buffer
        in_specs.append(_resident_spec(b_p.shape))   # bias:   resident, single buffer
        operands.extend([w_t, b_p])
    out_spec = pl.BlockSpec((tile_m, out_pad), lambda i: (i, 0))

    # Explicit VMEM budget: single-buffered weights + double-buffered x/out tiles
    # + f32 intermediates, capped by the generation's physical VMEM.
    weight_bytes = sum(w.size * w.dtype.itemsize for w in w_ops) \
                 + sum(b.size * b.dtype.itemsize for b in b_ops)
    io_bytes = 2 * tile_m * in_pad * x_item + 2 * tile_m * out_pad * out_item
    act_bytes = 2 * tile_m * max(sizes_pad) * 4
    vmem_limit = int(min(max(weight_bytes + io_bytes + act_bytes + (8 << 20), 32 << 20),
                         usable_vmem))

    flops = 2 * batch_pad * sum(sizes_pad[i] * sizes_pad[i + 1] for i in range(num_layers))
    bytes_accessed = int(weight_bytes + x_arr.size * x_item + batch_pad * out_pad * out_item)

    return pl.pallas_call(
        functools.partial(_fcnet_kernel, num_layers=num_layers),
        grid=grid,
        in_specs=in_specs,
        out_specs=out_spec,
        out_shape=jax.ShapeDtypeStruct((batch_pad, out_pad), out_dtype),
        compiler_params=pltpu.CompilerParams(
            dimension_semantics=("parallel",),
            vmem_limit_bytes=vmem_limit,
        ),
        cost_estimate=pl.CostEstimate(flops=flops, transcendentals=0,
                                      bytes_accessed=bytes_accessed),
    )(*operands)


# --------------------------------------------------------------------------- #
# streaming fallback (per-layer tiled matmul; weights don't fit VMEM resident)
# --------------------------------------------------------------------------- #
def _linear_kernel(x_ref, w_ref, b_ref, o_ref, acc_ref, *, apply_relu):
    @pl.when(pl.program_id(2) == 0)
    def _():
        acc_ref[...] = jnp.zeros_like(acc_ref)

    acc_ref[...] += jnp.dot(x_ref[...].astype(jnp.bfloat16), w_ref[...],
                            preferred_element_type=jnp.float32)

    @pl.when(pl.program_id(2) == pl.num_programs(2) - 1)
    def _():
        y = acc_ref[...] + b_ref[...]
        if apply_relu:
            y = jnp.maximum(y, 0.0)
        o_ref[...] = y.astype(o_ref.dtype)


def _linear_streamed(x_arr, w_t, b_p, *, apply_relu, out_dtype, tile_m, usable_vmem):
    M, K = x_arr.shape
    _, N = w_t.shape
    tk = _divisor_tile(K, 512)
    tn = _divisor_tile(N, 512)
    grid = (M // tile_m, N // tn, K // tk)
    out_item = jnp.dtype(out_dtype).itemsize
    x_item = x_arr.dtype.itemsize

    vmem_limit = int(min(max(2 * (tile_m * tk * x_item + tk * tn * 2 + tn * 4
                                  + tile_m * tn * out_item)
                             + tile_m * tn * 4 + (8 << 20), 32 << 20), usable_vmem))
    flops = 2 * M * K * N
    bytes_accessed = int(x_arr.size * x_item + w_t.size * 2 + b_p.size * 4 + M * N * out_item)

    return pl.pallas_call(
        functools.partial(_linear_kernel, apply_relu=apply_relu),
        grid=grid,
        in_specs=[
            pl.BlockSpec((tile_m, tk), lambda i, j, k: (i, k)),
            pl.BlockSpec((tk, tn), lambda i, j, k: (k, j)),
            pl.BlockSpec((1, tn), lambda i, j, k: (0, j)),
        ],
        out_specs=pl.BlockSpec((tile_m, tn), lambda i, j, k: (i, j)),
        out_shape=jax.ShapeDtypeStruct((M, N), out_dtype),
        scratch_shapes=[pltpu.VMEM((tile_m, tn), jnp.float32)],
        compiler_params=pltpu.CompilerParams(
            dimension_semantics=("parallel", "parallel", "arbitrary"),
            vmem_limit_bytes=vmem_limit,
        ),
        cost_estimate=pl.CostEstimate(flops=flops, transcendentals=0,
                                      bytes_accessed=bytes_accessed),
    )(x_arr, w_t, b_p)


def _fcnet_forward_streamed(x_arr, params, tile_m, out_dtype, usable_vmem):
    w_ops, b_ops = params["weights"], params["biases"]
    num_layers = len(w_ops)
    h = x_arr
    for i, (w_t, b_p) in enumerate(zip(w_ops, b_ops)):
        last = i == num_layers - 1
        h = _linear_streamed(h, w_t, b_p,
                             apply_relu=not last,
                             out_dtype=(out_dtype if last else jnp.bfloat16),
                             tile_m=tile_m, usable_vmem=usable_vmem)
    return h


# --------------------------------------------------------------------------- #
# public API
# --------------------------------------------------------------------------- #
def prepare_fcnet_params(weights, biases):
    """One-time (hoisted) parameter preparation — call once, reuse every forward.

    weights: list of (out_f, in_f) arrays (torch.nn.Linear convention)
    biases:  list of (out_f,) arrays
    """
    num_layers = len(weights)
    in_dim = int(weights[0].shape[1])
    out_dim = int(weights[-1].shape[0])
    layer_sizes = [in_dim] + [int(w.shape[0]) for w in weights]
    sizes_pad = [_round_up(s, 128) for s in layer_sizes]

    w_pads, b_pads = [], []
    for i in range(num_layers):
        w = jnp.asarray(weights[i])
        b = jnp.asarray(biases[i])
        fi, fo = sizes_pad[i], sizes_pad[i + 1]
        # (out_f, in_f) -> transposed + zero-padded (in_pad, out_pad), bf16.
        w_t = jnp.zeros((fi, fo), jnp.bfloat16)
        w_t = w_t.at[: w.shape[1], : w.shape[0]].set(w.T.astype(jnp.bfloat16))
        # bias pre-cast to f32, stored as a single (1, out_pad) row.
        b_p = jnp.zeros((1, fo), jnp.float32)
        b_p = b_p.at[0, : b.shape[0]].set(b.astype(jnp.float32))
        w_pads.append(w_t)
        b_pads.append(b_p)

    return {"weights": w_pads, "biases": b_pads,
            "in_dim": in_dim, "out_dim": out_dim, "sizes_pad": sizes_pad}


def fcnet_forward(x, params, *, batch_tile=None, out_dtype=None, force_stream=False):
    """FCNet forward: x (batch, in_dim) -> (batch, out_dim) using prepared params."""
    batch, in_dim = x.shape
    assert in_dim == params["in_dim"], "x feature dim does not match the network"
    sizes_pad = params["sizes_pad"]
    in_pad, out_pad = sizes_pad[0], sizes_pad[-1]
    out_dim = params["out_dim"]
    out_dtype = x.dtype if out_dtype is None else jnp.dtype(out_dtype)
    out_item = jnp.dtype(out_dtype).itemsize

    # ---- VMEM budget (generation aware) & batch-tile selection ----------------
    usable_vmem = int(_vmem_capacity_bytes() * 0.85)
    weight_bytes = sum(w.size * w.dtype.itemsize for w in params["weights"]) \
                 + sum(b.size * b.dtype.itemsize for b in params["biases"])
    if batch_tile is not None:
        tile_m = max(16, _round_up(min(batch_tile, _round_up(batch, 16)), 16))
    else:
        tile_m = _select_tile_m(batch, sizes_pad, weight_bytes, usable_vmem,
                                x.dtype.itemsize, out_item)

    # Resident weights don't fit even with the smallest tile -> stream per layer.
    min_io = (2 * 16 * in_pad * 2 + 2 * 16 * out_pad * out_item
              + 2 * 16 * max(sizes_pad) * 4)
    stream = force_stream or (weight_bytes + min_io + (4 << 20) > usable_vmem)

    # ---- x handling: zero-copy fast path when already lane/tile aligned -------
    if in_dim == in_pad and batch % tile_m == 0:
        x_arr = x                       # bf16 cast happens in-kernel on the tile
        batch_pad = batch
    else:
        batch_pad = _round_up(batch, tile_m)
        x_arr = jnp.zeros((batch_pad, in_pad), jnp.bfloat16)
        x_arr = x_arr.at[:batch, :in_dim].set(x.astype(jnp.bfloat16))

    if stream:
        out_padded = _fcnet_forward_streamed(x_arr, params, tile_m, out_dtype, usable_vmem)
    else:
        out_padded = _fcnet_forward_fused(x_arr, params, tile_m, out_dtype, usable_vmem)

    return out_padded[:batch, :out_dim]


# --------------------------------------------------------------------------- #
# references & init (torch.nn.Linear-equivalent)
# --------------------------------------------------------------------------- #
def init_fcnet_params(key, in_dim, hidden_dims, out_dim):
    """U(-1/sqrt(fan_in), 1/sqrt(fan_in)) init for weight and bias (torch default)."""
    layer_sizes = [in_dim] + list(hidden_dims) + [out_dim]
    weights, biases = [], []
    for fan_in, fan_out in zip(layer_sizes, layer_sizes[1:]):
        key, wk, bk = jax.random.split(key, 3)
        bound = 1.0 / jnp.sqrt(jnp.float32(fan_in))
        weights.append(jax.random.uniform(wk, (fan_out, fan_in), jnp.float32, -bound, bound))
        biases.append(jax.random.uniform(bk, (fan_out,), jnp.float32, -bound, bound))
    return weights, biases


def fcnet_reference_f32(x, weights, biases):
    """Pure-JAX f32 reference of the PyTorch forward pass."""
    h = x
    for i, (w, b) in enumerate(zip(weights, biases)):
        h = h @ w.T + b
        if i < len(weights) - 1:
            h = jax.nn.relu(h)
    return h


def fcnet_reference_bf16(x, weights, biases):
    """Pure-JAX reference matching the kernel's bf16-operand / f32-accumulate path."""
    h = x.astype(jnp.bfloat16)
    for i, (w, b) in enumerate(zip(weights, biases)):
        y = jnp.dot(h, w.T.astype(jnp.bfloat16),
                    preferred_element_type=jnp.float32) + b.astype(jnp.float32)
        if i < len(weights) - 1:
            h = jax.nn.relu(y).astype(jnp.bfloat16)
        else:
            h = y
    return h.astype(x.dtype)


if __name__ == "__main__":
    key = jax.random.PRNGKey(0)

    # --- Test 1: small, unaligned shapes (padded path, fused kernel) ----------
    batch, in_dim, hidden_dims, out_dim = 8, 16, [32, 32], 8
    key, xk, pk = jax.random.split(key, 3)
    x = jax.random.normal(xk, (batch, in_dim), jnp.float32)
    weights, biases = init_fcnet_params(pk, in_dim, hidden_dims, out_dim)
    params = prepare_fcnet_params(weights, biases)   # hoisted, reused per call

    out = jax.block_until_ready(fcnet_forward(x, params))
    assert out.shape == (batch, out_dim)
    ref_q = fcnet_reference_bf16(x, weights, biases)
    assert jnp.allclose(out, ref_q, atol=2e-3, rtol=2e-3), "mismatch vs bf16 reference"
    ref_f = fcnet_reference_f32(x, weights, biases)
    assert jnp.allclose(out, ref_f, atol=5e-2, rtol=5e-2), "mismatch vs f32 reference"

    # --- Test 2: 128-aligned shapes -> zero-copy x fast path (fused) ----------
    batch2, in2, hid2, out2 = 32, 128, [128], 128
    key, xk2, pk2 = jax.random.split(key, 3)
    x2 = jax.random.normal(xk2, (batch2, in2), jnp.float32)
    w2, b2 = init_fcnet_params(pk2, in2, hid2, out2)
    p2 = prepare_fcnet_params(w2, b2)
    out2_ = jax.block_until_ready(fcnet_forward(x2, p2))
    assert out2_.shape == (batch2, out2)
    ref2 = fcnet_reference_bf16(x2, w2, b2)
    assert jnp.allclose(out2_, ref2, atol=2e-3, rtol=2e-3), "mismatch (fast path)"

    # --- Test 3: forced weight-streaming fallback (per-layer tiled matmuls) ---
    out3 = jax.block_until_ready(fcnet_forward(x2, p2, force_stream=True))
    assert jnp.allclose(out3, ref2, atol=2e-3, rtol=2e-3), "mismatch (streamed path)"

    print("KERNEL_OK")
</pallas_src>

<mosaic_0001>
module attributes {stable_mosaic.version = 11 : i64} {
  func.func @_fcnet_kernel(%arg0: i32, %arg1: memref<16x128xbf16, #tpu.memory_space<vmem>>, %arg2: memref<128x128xbf16, #tpu.memory_space<vmem>>, %arg3: memref<1x128xf32, #tpu.memory_space<vmem>>, %arg4: memref<128x128xbf16, #tpu.memory_space<vmem>>, %arg5: memref<1x128xf32, #tpu.memory_space<vmem>>, %arg6: memref<128x128xbf16, #tpu.memory_space<vmem>>, %arg7: memref<1x128xf32, #tpu.memory_space<vmem>>, %arg8: memref<16x128xf32, #tpu.memory_space<vmem>>) attributes {dimension_semantics = [#tpu.dimension_semantics<parallel>], iteration_bounds = array<i64: 1>, scalar_prefetch = 0 : i64, scratch_operands = 0 : i64, tpu.core_type = #tpu.core_type<tc>, window_params = [{transform_indices = @transform_0, window_bounds = array<i64: 16, 128>}, {pipeline_mode = #tpu.pipeline_mode<synchronous>, transform_indices = @transform_1, window_bounds = array<i64: 128, 128>}, {pipeline_mode = #tpu.pipeline_mode<synchronous>, transform_indices = @transform_2, window_bounds = array<i64: 1, 128>}, {pipeline_mode = #tpu.pipeline_mode<synchronous>, transform_indices = @transform_3, window_bounds = array<i64: 128, 128>}, {pipeline_mode = #tpu.pipeline_mode<synchronous>, transform_indices = @transform_4, window_bounds = array<i64: 1, 128>}, {pipeline_mode = #tpu.pipeline_mode<synchronous>, transform_indices = @transform_5, window_bounds = array<i64: 128, 128>}, {pipeline_mode = #tpu.pipeline_mode<synchronous>, transform_indices = @transform_6, window_bounds = array<i64: 1, 128>}, {transform_indices = @transform_7, window_bounds = array<i64: 16, 128>}]} {
    %c0 = arith.constant 0 : index
    %c0_0 = arith.constant 0 : index
    %0 = vector.load %arg1[%c0, %c0_0] : memref<16x128xbf16, #tpu.memory_space<vmem>>, vector<16x128xbf16>
    %c0_1 = arith.constant 0 : index
    %c0_2 = arith.constant 0 : index
    %1 = vector.load %arg2[%c0_1, %c0_2] : memref<128x128xbf16, #tpu.memory_space<vmem>>, vector<128x128xbf16>
    %c0_3 = arith.constant 0 : index
    %c0_4 = arith.constant 0 : index
    %2 = vector.load %arg3[%c0_3, %c0_4] : memref<1x128xf32, #tpu.memory_space<vmem>>, vector<1x128xf32>
    %cst = arith.constant dense<0.000000e+00> : vector<16x128xf32>
    %3 = tpu.matmul %0, %1, %cst {dimension_numbers = #tpu.dot_dimension_numbers<[1], [0], [0], [1], [0, 0, 1, 1], [], []>} : vector<16x128xbf16>, vector<128x128xbf16>, vector<16x128xf32> -> vector<16x128xf32>
    %4 = vector.broadcast %2 : vector<1x128xf32> to vector<16x128xf32>
    %5 = arith.addf %3, %4 : vector<16x128xf32>
    %cst_5 = arith.constant 0.000000e+00 : f32
    %6 = vector.broadcast %cst_5 : f32 to vector<16x128xf32>
    %7 = arith.maximumf %5, %6 : vector<16x128xf32>
    %8 = arith.truncf %7 : vector<16x128xf32> to vector<16x128xbf16>
    %c0_6 = arith.constant 0 : index
    %c0_7 = arith.constant 0 : index
    %9 = vector.load %arg4[%c0_6, %c0_7] : memref<128x128xbf16, #tpu.memory_space<vmem>>, vector<128x128xbf16>
    %c0_8 = arith.constant 0 : index
    %c0_9 = arith.constant 0 : index
    %10 = vector.load %arg5[%c0_8, %c0_9] : memref<1x128xf32, #tpu.memory_space<vmem>>, vector<1x128xf32>
    %cst_10 = arith.constant dense<0.000000e+00> : vector<16x128xf32>
    %11 = tpu.matmul %8, %9, %cst_10 {dimension_numbers = #tpu.dot_dimension_numbers<[1], [0], [0], [1], [0, 0, 1, 1], [], []>} : vector<16x128xbf16>, vector<128x128xbf16>, vector<16x128xf32> -> vector<16x128xf32>
    %12 = vector.broadcast %10 : vector<1x128xf32> to vector<16x128xf32>
    %13 = arith.addf %11, %12 : vector<16x128xf32>
    %cst_11 = arith.constant 0.000000e+00 : f32
    %14 = vector.broadcast %cst_11 : f32 to vector<16x128xf32>
    %15 = arith.maximumf %13, %14 : vector<16x128xf32>
    %16 = arith.truncf %15 : vector<16x128xf32> to vector<16x128xbf16>
    %c0_12 = arith.constant 0 : index
    %c0_13 = arith.constant 0 : index
    %17 = vector.load %arg6[%c0_12, %c0_13] : memref<128x128xbf16, #tpu.memory_space<vmem>>, vector<128x128xbf16>
    %c0_14 = arith.constant 0 : index
    %c0_15 = arith.constant 0 : index
    %18 = vector.load %arg7[%c0_14, %c0_15] : memref<1x128xf32, #tpu.memory_space<vmem>>, vector<1x128xf32>
    %cst_16 = arith.constant dense<0.000000e+00> : vector<16x128xf32>
    %19 = tpu.matmul %16, %17, %cst_16 {dimension_numbers = #tpu.dot_dimension_numbers<[1], [0], [0], [1], [0, 0, 1, 1], [], []>} : vector<16x128xbf16>, vector<128x128xbf16>, vector<16x128xf32> -> vector<16x128xf32>
    %20 = vector.broadcast %18 : vector<1x128xf32> to vector<16x128xf32>
    %21 = arith.addf %19, %20 : vector<16x128xf32>
    %c0_17 = arith.constant 0 : index
    %c0_18 = arith.constant 0 : index
    %22 = vector.load %arg8[%c0_17, %c0_18] : memref<16x128xf32, #tpu.memory_space<vmem>>, vector<16x128xf32>
    tpu.vector_store %arg8[%c0_17, %c0_18], %21 {strides = array<i32>} : memref<16x128xf32, #tpu.memory_space<vmem>>, vector<16x128xf32>,
    return
  }
  func.func @transform_0(%arg0: i32) -> (i32, i32) {
    %c0_i32 = arith.constant 0 : i32
    %c0_i32_0 = arith.constant 0 : i32
    return %arg0, %c0_i32 : i32, i32
  }
  func.func @transform_1(%arg0: i32) -> (i32, i32) {
    %c0_i32 = arith.constant 0 : i32
    %c0_i32_0 = arith.constant 0 : i32
    %c0_i32_1 = arith.constant 0 : i32
    return %c0_i32, %c0_i32_0 : i32, i32
  }
  func.func @transform_2(%arg0: i32) -> (i32, i32) {
    %c0_i32 = arith.constant 0 : i32
    %c0_i32_0 = arith.constant 0 : i32
    %c0_i32_1 = arith.constant 0 : i32
    return %c0_i32, %c0_i32_0 : i32, i32
  }
  func.func @transform_3(%arg0: i32) -> (i32, i32) {
    %c0_i32 = arith.constant 0 : i32
    %c0_i32_0 = arith.constant 0 : i32
    %c0_i32_1 = arith.constant 0 : i32
    return %c0_i32, %c0_i32_0 : i32, i32
  }
  func.func @transform_4(%arg0: i32) -> (i32, i32) {
    %c0_i32 = arith.constant 0 : i32
    %c0_i32_0 = arith.constant 0 : i32
    %c0_i32_1 = arith.constant 0 : i32
    return %c0_i32, %c0_i32_0 : i32, i32
  }
  func.func @transform_5(%arg0: i32) -> (i32, i32) {
    %c0_i32 = arith.constant 0 : i32
    %c0_i32_0 = arith.constant 0 : i32
    %c0_i32_1 = arith.constant 0 : i32
    return %c0_i32, %c0_i32_0 : i32, i32
  }
  func.func @transform_6(%arg0: i32) -> (i32, i32) {
    %c0_i32 = arith.constant 0 : i32
    %c0_i32_0 = arith.constant 0 : i32
    %c0_i32_1 = arith.constant 0 : i32
    return %c0_i32, %c0_i32_0 : i32, i32
  }
  func.func @transform_7(%arg0: i32) -> (i32, i32) {
    %c0_i32 = arith.constant 0 : i32
    %c0_i32_0 = arith.constant 0 : i32
    return %arg0, %c0_i32 : i32, i32
  }
}

</mosaic_0001>

<bundles_post_ra>
// kernel: tpu_custom_call.1
= control target key start
LH: loop header
LB: loop body
LE: loop exit
PB: predicated region body
PF: predicated region fallthrough
CT: control target
= control target key end

     0   :  { %12 = vsyncpa [#allocation3], 0  ;;  %s899_s0 = inlined_call_operand.hbm [shape: bf16[16,128], index: 0, kind: input, shape index: {}]   ;;  %s900_s1 = inlined_call_operand.hbm [shape: bf16[128,128], index: 1, kind: input, shape index: {}]   ;;  %s901_s2 = inlined_call_operand.vmem [shape: f32[1,128], index: 2, kind: input, shape index: {}]   ;;  %s902_s3 = inlined_call_operand.hbm [shape: bf16[128,128], index: 3, kind: input, shape index: {}]   ;;  %s903_s4 = inlined_call_operand.vmem [shape: f32[1,128], index: 4, kind: input, shape index: {}]   ;;  %s904_s5 = inlined_call_operand.hbm [shape: bf16[128,128], index: 5, kind: input, shape index: {}]   ;;  %s905_s6 = inlined_call_operand.vmem [shape: f32[1,128], index: 6, kind: input, shape index: {}]   ;;  %s906_s7 = inlined_call_operand.hbm [shape: f32[16,128], index: 7, kind: output, shape index: {}]  }
   0x1   :  { %13 = vsyncpa [#allocation6], 0 }
   0x2   :  { %14 = vsyncpa [#allocation9], 0 }
   0x3   :  { %15 = vsyncpa [#allocation4], 0  ;;  %s723_s24 = smov [#allocation5]   ;;  %s724_s26 = smov [#allocation2]  }
   0x4   :  { %s33_s25 = sshll.u32 %s723_s24, 4  ;;  %s21_s27 = sshll.u32 %s724_s26, 4  ;;  %s34_s25 = int_to_ptr.vmem [resolvable:$true] %s33_s25  ;;  %s774_s27 = int_to_ptr.vmem [resolvable:$true] %s21_s27 }
   0x5   :  { %s605_s30 = scalar_lea.hbm %s900_s1, 1024 }
   0x6   :  { %p606_p0 = scmp.ne.s32.totalorder %s900_s1, %s605_s30  ;;  %p609_p1 = scmp.lt.u32.totalorder %s605_s30, %s900_s1 }
   0x8   :  { %p611_p2 = pnand %p609_p1, %p606_p0 }
   0xa   :  { %614 = shalt.err (!%p611_p2)
}
   0xb   :  { %s615_s12 = scalar_lea.vmem %s34_s25, 1024  ;;  %p620_p4 = scmp.lt.s32.totalorder %s34_s25, %s34_s25 }
   0xc   :  { %p616_p3 = scmp.ne.s32.totalorder %s34_s25, %s615_s12  ;;  %p621_p5 = scmp.lt.s32.totalorder %s615_s12, %s615_s12 }
   0xe   :  { %p622_p6 = por %p621_p5, %p620_p4 }
  0x10   :  { %p623_p7 = pnand %p622_p6, %p616_p3 }
  0x12   :  { %626 = shalt.err (!%p623_p7)
}
  0x13   :  { %s725_s13 = smov 64   ;;  %s726_s14 = smov 4  }
  0x14   :  { %39 = dma.hbm_to_vmem [thread:$0]  %s900_s1, 1024, %s34_s25, [#allocation6], %s725_s13, %s725_s13, %s726_s14  }
  0x15   :  { %s627_s19 = scalar_lea.hbm %s899_s0, 128 }
  0x16   :  { %p628_p8 = scmp.ne.s32.totalorder %s899_s0, %s627_s19  ;;  %p631_p9 = scmp.lt.u32.totalorder %s627_s19, %s899_s0 }
  0x18   :  { %p633_p10 = pnand %p631_p9, %p628_p8 }
  0x1a   :  { %636 = shalt.err (!%p633_p10)
}
  0x1b   :  { %s637_s24 = scalar_lea.vmem %s774_s27, 128  ;;  %p642_p12 = scmp.lt.s32.totalorder %s774_s27, %s774_s27 }
  0x1c   :  { %p638_p11 = scmp.ne.s32.totalorder %s774_s27, %s637_s24  ;;  %p643_p13 = scmp.lt.s32.totalorder %s637_s24, %s637_s24 }
  0x1e   :  { %p644_p0 = por %p643_p13, %p642_p12 }
  0x20   :  { %p645_p1 = pnand %p644_p0, %p638_p11 }
  0x22   :  { %648 = shalt.err (!%p645_p1)
}
  0x23   :  { %27 = dma.hbm_to_vmem [thread:$0]  %s899_s0, 128, %s774_s27, [#allocation3], %s725_s13, %s725_s13, %s726_s14  }
  0x24   :  { %s727_s26 = smov [#allocation7]   ;;  %s728_s29 = smov [#allocation8]  }
  0x25   :  { %s47_s28 = sshll.u32 %s727_s26, 4  ;;  %s61_s30 = sshll.u32 %s728_s29, 4  ;;  %s48_s28 = int_to_ptr.vmem [resolvable:$true] %s47_s28  ;;  %s811_s30 = int_to_ptr.vmem [resolvable:$true] %s61_s30 }
  0x26   :  { %s649_s10 = scalar_lea.hbm %s902_s3, 1024 }
  0x27   :  { %p650_p2 = scmp.ne.s32.totalorder %s902_s3, %s649_s10  ;;  %p653_p3 = scmp.lt.u32.totalorder %s649_s10, %s902_s3 }
  0x29   :  { %p655_p4 = pnand %p653_p3, %p650_p2 }
  0x2b   :  { %658 = shalt.err (!%p655_p4)
}
  0x2c   :  { %s659_s0 = scalar_lea.vmem %s48_s28, 1024  ;;  %p664_p6 = scmp.lt.s32.totalorder %s48_s28, %s48_s28 }
  0x2d   :  { %p660_p5 = scmp.ne.s32.totalorder %s48_s28, %s659_s0  ;;  %p665_p7 = scmp.lt.s32.totalorder %s659_s0, %s659_s0 }
  0x2f   :  { %p666_p8 = por %p665_p7, %p664_p6 }
  0x31   :  { %p667_p9 = pnand %p666_p8, %p660_p5 }
  0x33   :  { %670 = shalt.err (!%p667_p9)
}
  0x34   :  { %53 = dma.hbm_to_vmem [thread:$0]  %s902_s3, 1024, %s48_s28, [#allocation6], %s725_s13, %s725_s13, %s726_s14  }
  0x35   :  { %s671_s20 = scalar_lea.hbm %s904_s5, 1024 }
  0x36   :  { %p672_p10 = scmp.ne.s32.totalorder %s904_s5, %s671_s20  ;;  %p675_p11 = scmp.lt.u32.totalorder %s671_s20, %s904_s5 }
  0x38   :  { %p677_p12 = pnand %p675_p11, %p672_p10 }
  0x3a   :  { %680 = shalt.err (!%p677_p12)
}
  0x3b   :  { %s681_s1 = scalar_lea.vmem %s811_s30, 1024  ;;  %p686_p0 = scmp.lt.s32.totalorder %s811_s30, %s811_s30 }
  0x3c   :  { %p682_p13 = scmp.ne.s32.totalorder %s811_s30, %s681_s1  ;;  %p687_p1 = scmp.lt.s32.totalorder %s681_s1, %s681_s1 }
  0x3e   :  { %p688_p2 = por %p687_p1, %p686_p0 }
  0x40   :  { %p689_p3 = pnand %p688_p2, %p682_p13 }
  0x42   :  { %692 = shalt.err (!%p689_p3)
}
  0x43   :  { %67 = dma.hbm_to_vmem [thread:$0]  %s904_s5, 1024, %s811_s30, [#allocation9], %s725_s13, %s725_s13, %s726_s14  }
  0x44   :  { %715 = dma.done.wait [#allocation3], 128  }
  0x45   :  { %716 = vsyncadd [#allocation3], 4294967168 }
  0x46   :  { %717 = dma.done.wait [#allocation6], 2048  }
  0x47   :  { %718 = vsyncadd [#allocation6], 4294965248 }
  0x48   :  { %719 = dma.done.wait [#allocation9], 1024  }
  0x49   :  { %720 = vsyncadd [#allocation9], 4294966272  ;;  %v729_v0 = vmov 0.0   ;;  %vm730_vm0 = vmmov 0   ;;  %v580_v1 = vld [vmem:[#allocation5] sm:$0xff]   ;;  %v581_v2 = vld [vmem:[#allocation5 + $0x8] sm:$0xff]  }
  0x4a   :  { %509 = vmatprep.subr.bf16.mxu0 %v729_v0  ;;  %525 = vmatprep.mubr.msk.bf16.mxu0 %vm730_vm0, %v729_v0  ;;  %v582_v3 = vld [vmem:[#allocation5 + $0x10] sm:$0xff]   ;;  %v589_v4 = vld [vmem:[#allocation7] sm:$0xff]   ;;  %v583_v5 = vld [vmem:[#allocation5 + $0x18] sm:$0xff]   ;;  %s731_s29 = smov [#allocation10]  }
  0x4b   :  { %529 = vmatprep.subr.bf16.mxu1 %v729_v0  ;;  %545 = vmatprep.mubr.msk.bf16.mxu1 %vm730_vm0, %v729_v0  ;;  %v590_v6 = vld [vmem:[#allocation7 + $0x8] sm:$0xff]   ;;  %v584_v7 = vld [vmem:[#allocation5 + $0x20] sm:$0xff]   ;;  %v591_v8 = vld [vmem:[#allocation7 + $0x10] sm:$0xff]   ;;  %s440_s30 = sshll.u32 %s731_s29, 4  ;;  %s441_s30 = int_to_ptr.vmem [resolvable:$true] %s440_s30 }
  0x4c   :  { %510 = vmatpush3.bf16.msra.mxu0 %v580_v1  ;;  %530 = vmatpush3.bf16.msra.mxu1 %v589_v4  ;;  %v585_v9 = vld [vmem:[#allocation5 + $0x28] sm:$0xff]   ;;  %v592_v10 = vld [vmem:[#allocation7 + $0x18] sm:$0xff]   ;;  %v586_v11 = vld [vmem:[#allocation5 + $0x30] sm:$0xff]   ;;  %p698_p5 = scmp.lt.s32.totalorder %s441_s30, %s441_s30 }
  0x4d   :  { %511 = vmatprep.subr.bf16.mxu0 %v729_v0  ;;  %531 = vmatprep.subr.bf16.mxu1 %v729_v0  ;;  %v593_v12 = vld [vmem:[#allocation7 + $0x20] sm:$0xff]   ;;  %v587_v13 = vld [vmem:[#allocation5 + $0x38] sm:$0xff]   ;;  %v594_v14 = vld [vmem:[#allocation7 + $0x28] sm:$0xff]  }
  0x4e   :  { %v588_v15 = vld [vmem:[#allocation2] sm:$0xff]   ;;  %v595_v16 = vld [vmem:[#allocation7 + $0x30] sm:$0xff]   ;;  %v597_v18 = vld [vmem:[#allocation8] sm:$0xff]  }
  0x4f   :  { %v596_v17 = vld [vmem:[#allocation7 + $0x38] sm:$0xff]   ;;  %v598_v19 = vld [vmem:[#allocation8 + $0x8] sm:$0xff]   ;;  %v599_v20 = vld [vmem:[#allocation8 + $0x10] sm:$0xff]  }
  0x50   :  { %512 = vmatpush3.bf16.msra.mxu0 %v581_v2  ;;  %532 = vmatpush3.bf16.msra.mxu1 %v590_v6  ;;  %v600_v21 = vld [vmem:[#allocation8 + $0x18] sm:$0xff]   ;;  %v601_v22 = vld [vmem:[#allocation8 + $0x20] sm:$0xff]   ;;  %v602_v23 = vld [vmem:[#allocation8 + $0x28] sm:$0xff]  }
  0x51   :  { %513 = vmatprep.subr.bf16.mxu0 %v729_v0  ;;  %533 = vmatprep.subr.bf16.mxu1 %v729_v0  ;;  %v454_v24 = vld [vmem:[%s901_s2] ss:$0 sm:$0xff]  ;;  %v603_v34 = vld [vmem:[#allocation8 + $0x30] sm:$0xff]  }
  0x52   :  { %v604_v35 = vld [vmem:[#allocation8 + $0x38] sm:$0xff]  }
  0x53   :  { %v464_v36 = vld [vmem:[%s903_s4] ss:$0 sm:$0xff]  ;;  %s693_s4 = scalar_lea.vmem %s441_s30, 256 }
  0x54   :  { %514 = vmatpush3.bf16.msra.mxu0 %v582_v3  ;;  %534 = vmatpush3.bf16.msra.mxu1 %v591_v8  ;;  %v473_v46 = vld [vmem:[%s905_s6] ss:$0 sm:$0xff]  ;;  %p694_p4 = scmp.ne.s32.totalorder %s441_s30, %s693_s4  ;;  %p699_p6 = scmp.lt.s32.totalorder %s693_s4, %s693_s4 }
  0x55   :  { %515 = vmatprep.subr.bf16.mxu0 %v729_v0  ;;  %535 = vmatprep.subr.bf16.mxu1 %v729_v0 }
  0x56   :  { %p700_p7 = por %p699_p6, %p698_p5 }
  0x58   :  { %516 = vmatpush3.bf16.msra.mxu0 %v583_v5  ;;  %536 = vmatpush3.bf16.msra.mxu1 %v592_v10  ;;  %p701_p8 = pnand %p700_p7, %p694_p4 }
  0x59   :  { %517 = vmatprep.subr.bf16.mxu0 %v729_v0  ;;  %537 = vmatprep.subr.bf16.mxu1 %v729_v0 }
  0x5c   :  { %518 = vmatpush3.bf16.msra.mxu0 %v584_v7  ;;  %538 = vmatpush3.bf16.msra.mxu1 %v593_v12 }
  0x5d   :  { %519 = vmatprep.subr.bf16.mxu0 %v729_v0  ;;  %539 = vmatprep.subr.bf16.mxu1 %v729_v0 }
  0x60   :  { %520 = vmatpush3.bf16.msra.mxu0 %v585_v9  ;;  %540 = vmatpush3.bf16.msra.mxu1 %v594_v14 }
  0x61   :  { %521 = vmatprep.subr.bf16.mxu0 %v729_v0  ;;  %541 = vmatprep.subr.bf16.mxu1 %v729_v0 }
  0x64   :  { %522 = vmatpush3.bf16.msra.mxu0 %v586_v11  ;;  %542 = vmatpush3.bf16.msra.mxu1 %v595_v16 }
  0x65   :  { %523 = vmatprep.subr.bf16.mxu0 %v729_v0  ;;  %543 = vmatprep.subr.bf16.mxu1 %v729_v0 }
  0x68   :  { %524 = vmatpush3.bf16.msra.mxu0 %v587_v13  ;;  %544 = vmatpush3.bf16.msra.mxu1 %v596_v17 }
  0x69   :  { %549 = vmatprep.subr.bf16.mxu0 %v729_v0 }
  0x6b   :  { %526 = vmatmul.mubr.bf16.vlgmr.msra.gmra.mrb[0].mxu0 %v588_v15 }
  0x6c   :  { %565 = vmatprep.mubr.msk.bf16.mxu0 %vm730_vm0, %v729_v0  ;;  %550 = vmatpush3.bf16.msra.mxu0 %v597_v18 }
  0x6d   :  { %551 = vmatprep.subr.bf16.mxu0 %v729_v0 }
  0x70   :  { %552 = vmatpush3.bf16.msra.mxu0 %v598_v19 }
  0x71   :  { %553 = vmatprep.subr.bf16.mxu0 %v729_v0 }
  0x74   :  { %554 = vmatpush3.bf16.msra.mxu0 %v599_v20 }
  0x75   :  { %555 = vmatprep.subr.bf16.mxu0 %v729_v0 }
  0x78   :  { %556 = vmatpush3.bf16.msra.mxu0 %v600_v21 }
  0x79   :  { %557 = vmatprep.subr.bf16.mxu0 %v729_v0 }
  0x7c   :  { %558 = vmatpush3.bf16.msra.mxu0 %v601_v22 }
  0x7d   :  { %559 = vmatprep.subr.bf16.mxu0 %v729_v0 }
  0x80   :  { %560 = vmatpush3.bf16.msra.mxu0 %v602_v23 }
  0x81   :  { %561 = vmatprep.subr.bf16.mxu0 %v729_v0 }
  0x84   :  { %562 = vmatpush3.bf16.msra.mxu0 %v603_v34 }
  0x85   :  { %563 = vmatprep.subr.bf16.mxu0 %v729_v0 }
  0x88   :  { %564 = vmatpush3.bf16.msra.mxu0 %v604_v35 }
 0x13e   :  { %v196_v25 = vpop.f32.mrb[0].mxu0 }
 0x13f   :  { %v197_v26 = vadd.f32 %v454_v24, %v196_v25  ;;  %v527_v27 = vpop.f32.mrb[1].mxu0 }
 0x140   :  { %v199_v28 = vpop.f32.mrb[2].mxu0 }
 0x141   :  { %v200_v29 = vadd.f32 %v454_v24, %v199_v28  ;;  %v528_v30 = vpop.f32.mrb[3].mxu0  ;;  %v203_v31 = vmax.f32 %v197_v26, 0.0 }
 0x143   :  { %v204_v32 = vmax.f32 %v200_v29, 0.0 }
 0x145   :  { %v205_v33 = vpack.c.bf16 %v204_v32, %v203_v31 }
 0x147   :  { %546 = vmatmul.mubr.bf16.vlgmr.msra.gmra.mrb[0].mxu1 %v205_v33 }
 0x21a   :  { %v311_v37 = vpop.f32.mrb[0].mxu1 }
 0x21b   :  { %v312_v38 = vadd.f32 %v464_v36, %v311_v37  ;;  %v547_v39 = vpop.f32.mrb[1].mxu1 }
 0x21c   :  { %v314_v40 = vpop.f32.mrb[2].mxu1 }
 0x21d   :  { %v315_v41 = vadd.f32 %v464_v36, %v314_v40  ;;  %v548_v42 = vpop.f32.mrb[3].mxu1  ;;  %v318_v43 = vmax.f32 %v312_v38, 0.0 }
 0x21f   :  { %v319_v44 = vmax.f32 %v315_v41, 0.0 }
 0x221   :  { %v320_v45 = vpack.c.bf16 %v319_v44, %v318_v43 }
 0x223   :  { %566 = vmatmul.mubr.bf16.vlgmr.msra.gmra.mrb[4].mxu0 %v320_v45 }
 0x2f6   :  { %v426_v47 = vpop.f32.mrb[4].mxu0 }
 0x2f7   :  { %v427_v48 = vadd.f32 %v473_v46, %v426_v47  ;;  %v567_v49 = vpop.f32.mrb[5].mxu0 }
 0x2f8   :  { %v429_v50 = vpop.f32.mrb[6].mxu0 }
 0x2f9   :  { %433 = vst [vmem:[#allocation10] sm:$0xff] %v427_v48  ;;  %v430_v51 = vadd.f32 %v473_v46, %v429_v50  ;;  %v568_v52 = vpop.f32.mrb[7].mxu0 }
 0x2fb   :  { %434 = vst [vmem:[#allocation10 + $0x8] sm:$0xff] %v430_v51 }
 0x2fc   :  { %704 = shalt.err (!%p701_p8)
}
 0x2fd   :  { %s705_s9 = scalar_lea.hbm %s906_s7, 256 }
 0x2fe   :  { %p706_p9 = scmp.ne.s32.totalorder %s906_s7, %s705_s9  ;;  %p709_p10 = scmp.lt.u32.totalorder %s705_s9, %s906_s7 }
 0x300   :  { %p711_p11 = pnand %p709_p10, %p706_p9 }
 0x302   :  { %714 = shalt.err (!%p711_p11)
}
 0x303   :  { %s732_s16 = smov 128   ;;  %s733_s0 = smov 8  }
 0x304   :  { %446 = dma.vmem_to_hbm [thread:$0]  %s441_s30, 256, %s906_s7, [#allocation4], %s732_s16, %s732_s16, %s733_s0  }
 0x305   :  { %721 = dma.done.wait [#allocation4], 256  }
 0x306   :  { %722 = vsyncadd [#allocation4], 4294967040 }
 0x307   :  { %450 = vsyncpa [#allocation3], 1 }
 0x308   :  { %451 = vsyncpa [#allocation6], 1 }
 0x309   :  { %452 = vsyncpa [#allocation9], 1 }
 0x30a   :  { %453 = vsyncpa [#allocation4], 1 }

</bundles_post_ra>
